<compile_context>
chip_gen: v7x
topology: tpu7x:2x2x1
jax: 0.10.0
libtpu: 0.0.40
codegen_flags: <defaults>
</compile_context>

<pallas_src>
import functools

import jax
import jax.numpy as jnp
import numpy as np
from jax.experimental import pallas as pl
from jax.experimental.pallas import tpu as pltpu


def _tpu_defaults():
    """Best-effort (vmem_capacity_bytes, tensorcores_per_chip); safe fallbacks."""
    vmem = None
    cores = 1
    try:
        info = pltpu.get_tpu_info()
    except Exception:
        return vmem, cores
    for name in ("vmem_capacity_bytes", "vmem_bytes", "vmem_size_bytes"):
        try:
            v = int(getattr(info, name))
        except (AttributeError, TypeError, ValueError):
            continue
        if v > 0:
            vmem = v
            break
    for name in ("num_tensorcores", "tensorcore_count", "num_cores", "core_count",
                 "cores_per_chip"):
        try:
            v = int(getattr(info, name))
        except (AttributeError, TypeError, ValueError):
            continue
        if v > 0:
            cores = max(1, min(v, 2))   # megacore axis: at most 2 TCs per chip (v7x)
            break
    return vmem, cores


def _heatmap_loss_kernel(pre_ref, lab_ref, vis_ref, out_ref, acc_ref, *,
                         loss_type, steps, rows_valid):
    g = pl.program_id(0)
    s = pl.program_id(1)

    @pl.when(s == 0)
    def _init():
        acc_ref[...] = jnp.zeros_like(acc_ref)

    rt = pre_ref.shape[0]
    row_block = g * steps + s                     # un-clamped logical tile index
    r0 = pl.multiple_of(row_block * rt, 8)        # global row offset of this tile

    pre = pre_ref[...].astype(jnp.float32)        # (rt, L)
    lab = lab_ref[...].astype(jnp.float32)        # (rt, L)
    vis = vis_ref[pl.ds(r0, rt), :].astype(jnp.float32)   # (rt, 1), resident vis slab

    # Fused row-wise loss (no log_p / elem temporaries):
    #   log_p = z - lse,  z = pre - max(pre)
    #   KL : sum_j lab*(log lab - log_p) = sum(xlogy(lab,lab)) + lse*sum(lab) - sum(lab*z)
    #   CE : -sum_j lab*log_p            =                       lse*sum(lab) - sum(lab*z)
    m = jnp.max(pre, axis=-1, keepdims=True)
    z = pre - m
    lse = jnp.log(jnp.sum(jnp.exp(z), axis=-1, keepdims=True))
    s_lab = jnp.sum(lab, axis=-1, keepdims=True)
    s_labz = jnp.sum(lab * z, axis=-1, keepdims=True)
    row_loss = lse * s_lab - s_labz
    if loss_type == "KL":
        # Labels are probability heatmaps (>= 0); xlogy-style guard for exact zeros
        # (matches nn.KLDivLoss's target>0 handling).
        ent = jnp.where(lab > 0.0, lab * jnp.log(jnp.where(lab > 0.0, lab, 1.0)), 0.0)
        row_loss = row_loss + jnp.sum(ent, axis=-1, keepdims=True)

    # Mask rows past the true row count: the ragged last tile (and clamped overshoot
    # tiles) may contain stale VMEM data; the where-select keeps any NaN out of acc.
    row_idx = r0 + jax.lax.broadcasted_iota(jnp.int32, (rt, 1), 0)
    valid = row_idx < rows_valid
    acc_ref[...] += jnp.where(valid, row_loss * vis, 0.0)

    @pl.when(s == pl.num_programs(1) - 1)
    def _finalize():
        # One cross-lane/sublane reduce per row-group, written lane-dense.
        out_ref[...] = jnp.broadcast_to(jnp.sum(acc_ref[...]), out_ref.shape)


def distribution_heatmap_loss(heatmap_pre, heatmap_label, points_vis, *,
                              loss_type="KL", beta=1.0, now_epoch=None,
                              target_block_bytes=None):
    """Pallas forward for DistributionHeatmapLoss (weight_strategy=None)."""
    del now_epoch  # Beta.step() is a no-op when weight_strategy is None.
    assert loss_type in ("KL", "CE")
    assert heatmap_pre.shape == heatmap_label.shape and heatmap_pre.ndim == 4
    B, N, H, W = heatmap_pre.shape
    assert points_vis.shape == (B, N)
    R, L = B * N, H * W

    # Heatmaps stay in their storage dtype (bf16 OK); the kernel widens to f32.
    pre2d = heatmap_pre.reshape(R, L)
    lab2d = heatmap_label.reshape(R, L)
    vis2d = points_vis.reshape(R, 1).astype(jnp.float32)

    vmem_capacity, tc_count = _tpu_defaults()
    if target_block_bytes is None:
        if vmem_capacity is not None and vmem_capacity >= (96 << 20):
            target_block_bytes = 4 << 20    # v5e / v6e: 128 MiB physical VMEM
        elif vmem_capacity is not None:
            target_block_bytes = 3 << 20    # v7x: 64 MiB physical VMEM
        else:
            target_block_bytes = 2 << 20    # unknown: conservative
    vmem_limit = int(max(32 << 20, min((vmem_capacity or (64 << 20)) // 2, 64 << 20)))

    itemsize = max(int(jnp.dtype(heatmap_pre.dtype).itemsize),
                   int(jnp.dtype(heatmap_label.dtype).itemsize))
    sub = 16 if itemsize == 2 else 8
    rt = (target_block_bytes // max(1, L * itemsize)) // sub * sub
    rt = int(max(sub, min(rt, -(-R // sub) * sub)))
    # TODO(synk): for very large H*W (L*itemsize >~ target_block_bytes) add a column
    # grid axis with an online log-sum-exp so blocks become (rt, tile_L) instead of a
    # whole row; matters first on v7x's 64 MiB VMEM.

    n_tiles = -(-R // rt)
    groups = max(1, min(tc_count, n_tiles))   # 2 on v7x (two TensorCores), else 1
    steps = -(-n_tiles // groups)
    r_pad = groups * steps * rt

    # Only points_vis (R*4 bytes) is padded; the heatmaps are streamed un-padded and
    # ragged / overshoot tiles are masked in-kernel.
    if r_pad != R:
        vis2d = jnp.pad(vis2d, ((0, r_pad - R), (0, 0)))

    kernel = functools.partial(_heatmap_loss_kernel, loss_type=loss_type,
                               steps=steps, rows_valid=R)

    last_tile = n_tiles - 1
    # Clamp so a block start is never requested past the array end; clamped (overshoot)
    # tiles re-read the last tile and are fully masked out in-kernel.
    hm_map = lambda g, s: (jnp.minimum(g * steps + s, last_tile), 0)
    vis_map = lambda g, s: (0, 0)     # single resident block, DMA'd once
    out_map = lambda g, s: (g, 0)

    cost = pl.CostEstimate(
        flops=7 * R * L,
        transcendentals=(2 if loss_type == "KL" else 1) * R * L + R,
        bytes_accessed=R * L * (int(jnp.dtype(heatmap_pre.dtype).itemsize)
                                + int(jnp.dtype(heatmap_label.dtype).itemsize))
                       + r_pad * 4 + groups * 8 * 128 * 4,
    )

    out = pl.pallas_call(
        kernel,
        out_shape=jax.ShapeDtypeStruct((groups * 8, 128), jnp.float32),
        grid_spec=pltpu.PrefetchScalarGridSpec(
            num_scalar_prefetch=0,
            grid=(groups, steps),
            in_specs=[
                pl.BlockSpec((rt, L), hm_map),
                pl.BlockSpec((rt, L), hm_map),
                pl.BlockSpec((r_pad, 1), vis_map),   # full-extent, stays resident
            ],
            out_specs=pl.BlockSpec((8, 128), out_map),
            scratch_shapes=[pltpu.VMEM((rt, 1), jnp.float32)],
        ),
        compiler_params=pltpu.CompilerParams(
            # TODO(synk): on v7x verify in the trace that the leading "parallel" axis
            # actually shards across the two TensorCores; if not, switch it to
            # pltpu.CORE_PARALLEL / pl.core_map.
            dimension_semantics=("parallel", "arbitrary"),
            vmem_limit_bytes=vmem_limit,
        ),
        cost_estimate=cost,
    )(pre2d, lab2d, vis2d)

    # One representative value per row-group block; beta/B applied outside the kernel
    # so an epoch-dependent beta never forces a recompile.
    total = out.reshape(groups, 8, 128)[:, 0, 0].sum()
    return total * (jnp.float32(beta) / jnp.float32(B))


def _reference(heatmap_pre, heatmap_label, points_vis, *, loss_type, beta):
    B, N, H, W = heatmap_pre.shape
    pre = heatmap_pre.reshape(B * N, H * W).astype(jnp.float32)
    lab = heatmap_label.reshape(B * N, H * W).astype(jnp.float32)
    log_p = jax.nn.log_softmax(pre, axis=1)
    if loss_type == "KL":
        safe = jnp.where(lab > 0, lab, 1.0)
        elem = jnp.where(lab > 0, lab * (jnp.log(safe) - log_p), 0.0)
    else:
        elem = -lab * log_p
    loss_item = elem.sum(axis=1).reshape(B, N) * points_vis.astype(jnp.float32)
    return loss_item.sum(axis=1).mean() * beta


if __name__ == "__main__":
    B, N, H, W = 2, 4, 16, 16
    key = jax.random.PRNGKey(0)
    k1, k2, k3 = jax.random.split(key, 3)
    heatmap_pre = jax.random.normal(k1, (B, N, H, W), dtype=jnp.float32)
    # Label heatmaps are probability distributions over H*W (as KLDivLoss expects),
    # with some exact zeros to exercise the target==0 handling.
    lab_logits = jax.random.normal(k2, (B, N, H, W), dtype=jnp.float32)
    heatmap_label = jax.nn.softmax(
        lab_logits.reshape(B, N, H * W), axis=-1).reshape(B, N, H, W)
    heatmap_label = heatmap_label.at[:, :, 0, :].set(0.0)
    points_vis = (jax.random.uniform(k3, (B, N)) > 0.25).astype(jnp.float32)

    beta = 1.0  # Beta(beta=1, weight_strategy=None) -> constant multiplier

    for loss_type in ("KL", "CE"):
        out = distribution_heatmap_loss(heatmap_pre, heatmap_label, points_vis,
                                        loss_type=loss_type, beta=beta)
        out = jax.block_until_ready(out)
        ref = _reference(heatmap_pre, heatmap_label, points_vis,
                         loss_type=loss_type, beta=beta)
        # The kernel uses the algebraically fused (reassociated) f32 row-loss, so allow
        # ~1e-4 relative slack vs the elementwise reference.
        assert np.allclose(np.asarray(out), np.asarray(ref),
                           rtol=1e-4, atol=1e-5), (loss_type, float(out), float(ref))

    print("KERNEL_OK")
</pallas_src>

<mosaic_0001>
module attributes {stable_mosaic.version = 11 : i64} {
  func.func @_heatmap_loss_kernel(%arg0: i32, %arg1: i32, %arg2: memref<8x256xf32, #tpu.memory_space<vmem>>, %arg3: memref<8x256xf32, #tpu.memory_space<vmem>>, %arg4: memref<8x1xf32, #tpu.memory_space<vmem>>, %arg5: memref<8x128xf32, #tpu.memory_space<vmem>>, %arg6: memref<8x1xf32, #tpu.memory_space<vmem>>) attributes {dimension_semantics = [#tpu.dimension_semantics<parallel>, #tpu.dimension_semantics<arbitrary>], iteration_bounds = array<i64: 1, 1>, scalar_prefetch = 0 : i64, scratch_operands = 1 : i64, tpu.core_type = #tpu.core_type<tc>, window_params = [{transform_indices = @transform_0, window_bounds = array<i64: 8, 256>}, {transform_indices = @transform_1, window_bounds = array<i64: 8, 256>}, {pipeline_mode = #tpu.pipeline_mode<synchronous>, transform_indices = @transform_2, window_bounds = array<i64: 8, 1>}, {transform_indices = @transform_3, window_bounds = array<i64: 8, 128>}]} {
    %c0_i32 = arith.constant 0 : i32
    %0 = arith.cmpi eq, %arg1, %c0_i32 : i32
    %1 = arith.extui %0 : i1 to i32
    %c0_i32_0 = arith.constant 0 : i32
    %2 = arith.cmpi ne, %1, %c0_i32_0 : i32
    scf.if %2 {
      %cst_21 = arith.constant 0.000000e+00 : f32
      %53 = vector.broadcast %cst_21 : f32 to vector<8x1xf32>
      %c0_22 = arith.constant 0 : index
      %c0_23 = arith.constant 0 : index
      %54 = vector.load %arg6[%c0_22, %c0_23] : memref<8x1xf32, #tpu.memory_space<vmem>>, vector<8x1xf32>
      tpu.vector_store %arg6[%c0_22, %c0_23], %53 {strides = array<i32>} : memref<8x1xf32, #tpu.memory_space<vmem>>, vector<8x1xf32>,
    } else {
    }
    %c1_i32 = arith.constant 1 : i32
    %3 = arith.muli %arg0, %c1_i32 : i32
    %4 = arith.addi %3, %arg1 : i32
    %c8_i32 = arith.constant 8 : i32
    %5 = arith.muli %4, %c8_i32 : i32
    %6 = tpu.assume_multiple %5, 8 : i32
    %c0 = arith.constant 0 : index
    %c0_1 = arith.constant 0 : index
    %7 = vector.load %arg2[%c0, %c0_1] : memref<8x256xf32, #tpu.memory_space<vmem>>, vector<8x256xf32>
    %c0_2 = arith.constant 0 : index
    %c0_3 = arith.constant 0 : index
    %8 = vector.load %arg3[%c0_2, %c0_3] : memref<8x256xf32, #tpu.memory_space<vmem>>, vector<8x256xf32>
    %9 = arith.index_cast %6 : i32 to index
    %c0_4 = arith.constant 0 : index
    %10 = vector.load %arg4[%9, %c0_4] : memref<8x1xf32, #tpu.memory_space<vmem>>, vector<8x1xf32>
    %cst = arith.constant dense<0xFF800000> : vector<8xf32>
    %11 = vector.multi_reduction <maximumf>, %7, %cst [1] : vector<8x256xf32> to vector<8xf32>
    %12 = vector.shape_cast %11 : vector<8xf32> to vector<8x1xf32>
    %13 = vector.broadcast %12 : vector<8x1xf32> to vector<8x256xf32>
    %14 = arith.subf %7, %13 : vector<8x256xf32>
    %15 = math.exp %14 : vector<8x256xf32>
    %cst_5 = arith.constant dense<0.000000e+00> : vector<8xf32>
    %16 = vector.multi_reduction <add>, %15, %cst_5 [1] : vector<8x256xf32> to vector<8xf32>
    %17 = vector.shape_cast %16 : vector<8xf32> to vector<8x1xf32>
    %18 = math.log %17 : vector<8x1xf32>
    %cst_6 = arith.constant dense<0.000000e+00> : vector<8xf32>
    %19 = vector.multi_reduction <add>, %8, %cst_6 [1] : vector<8x256xf32> to vector<8xf32>
    %20 = vector.shape_cast %19 : vector<8xf32> to vector<8x1xf32>
    %21 = arith.mulf %8, %14 : vector<8x256xf32>
    %cst_7 = arith.constant dense<0.000000e+00> : vector<8xf32>
    %22 = vector.multi_reduction <add>, %21, %cst_7 [1] : vector<8x256xf32> to vector<8xf32>
    %23 = vector.shape_cast %22 : vector<8xf32> to vector<8x1xf32>
    %24 = arith.mulf %18, %20 : vector<8x1xf32>
    %25 = arith.subf %24, %23 : vector<8x1xf32>
    %cst_8 = arith.constant 0.000000e+00 : f32
    %26 = vector.broadcast %cst_8 : f32 to vector<8x256xf32>
    %27 = arith.cmpf ogt, %8, %26 : vector<8x256xf32>
    %cst_9 = arith.constant 0.000000e+00 : f32
    %28 = vector.broadcast %cst_9 : f32 to vector<8x256xf32>
    %29 = arith.cmpf ogt, %8, %28 : vector<8x256xf32>
    %cst_10 = arith.constant 1.000000e+00 : f32
    %30 = vector.broadcast %cst_10 : f32 to vector<8x256xf32>
    %31 = arith.select %29, %8, %30 : vector<8x256xi1>, vector<8x256xf32>
    %32 = math.log %31 : vector<8x256xf32>
    %33 = arith.mulf %8, %32 : vector<8x256xf32>
    %cst_11 = arith.constant 0.000000e+00 : f32
    %34 = vector.broadcast %cst_11 : f32 to vector<8x256xf32>
    %35 = arith.select %27, %33, %34 : vector<8x256xi1>, vector<8x256xf32>
    %cst_12 = arith.constant dense<0.000000e+00> : vector<8xf32>
    %36 = vector.multi_reduction <add>, %35, %cst_12 [1] : vector<8x256xf32> to vector<8xf32>
    %37 = vector.shape_cast %36 : vector<8xf32> to vector<8x1xf32>
    %38 = arith.addf %25, %37 : vector<8x1xf32>
    %39 = tpu.iota {dimensions = array<i32: 0>} : vector<8x1xi32>
    %40 = vector.broadcast %6 : i32 to vector<8x1xi32>
    %41 = arith.addi %40, %39 : vector<8x1xi32>
    %c8_i32_13 = arith.constant 8 : i32
    %42 = vector.broadcast %c8_i32_13 : i32 to vector<8x1xi32>
    %43 = arith.cmpi slt, %41, %42 : vector<8x1xi32>
    %c0_14 = arith.constant 0 : index
    %c0_15 = arith.constant 0 : index
    %44 = vector.load %arg6[%c0_14, %c0_15] : memref<8x1xf32, #tpu.memory_space<vmem>>, vector<8x1xf32>
    %45 = arith.mulf %38, %10 : vector<8x1xf32>
    %cst_16 = arith.constant 0.000000e+00 : f32
    %46 = vector.broadcast %cst_16 : f32 to vector<8x1xf32>
    %47 = arith.select %43, %45, %46 : vector<8x1xi1>, vector<8x1xf32>
    %48 = arith.addf %44, %47 : vector<8x1xf32>
    %c0_17 = arith.constant 0 : index
    %c0_18 = arith.constant 0 : index
    %49 = vector.load %arg6[%c0_17, %c0_18] : memref<8x1xf32, #tpu.memory_space<vmem>>, vector<8x1xf32>
    tpu.vector_store %arg6[%c0_17, %c0_18], %48 {strides = array<i32>} : memref<8x1xf32, #tpu.memory_space<vmem>>, vector<8x1xf32>,
    %c0_i32_19 = arith.constant 0 : i32
    %50 = arith.cmpi eq, %arg1, %c0_i32_19 : i32
    %51 = arith.extui %50 : i1 to i32
    %c0_i32_20 = arith.constant 0 : i32
    %52 = arith.cmpi ne, %51, %c0_i32_20 : i32
    scf.if %52 {
      %c0_21 = arith.constant 0 : index
      %c0_22 = arith.constant 0 : index
      %53 = vector.load %arg6[%c0_21, %c0_22] : memref<8x1xf32, #tpu.memory_space<vmem>>, vector<8x1xf32>
      %54 = vector.shape_cast %53 : vector<8x1xf32> to vector<1x8x1xf32>
      %cst_23 = arith.constant dense<0.000000e+00> : vector<1xf32>
      %55 = vector.multi_reduction <add>, %54, %cst_23 [1, 2] : vector<1x8x1xf32> to vector<1xf32>
      %56 = vector.shape_cast %55 : vector<1xf32> to vector<1x1x1xf32>
      %57 = vector.extract %56[0, 0, 0] : f32 from vector<1x1x1xf32>
      %58 = vector.broadcast %57 : f32 to vector<8x128xf32>
      %c0_24 = arith.constant 0 : index
      %c0_25 = arith.constant 0 : index
      %59 = vector.load %arg5[%c0_24, %c0_25] : memref<8x128xf32, #tpu.memory_space<vmem>>, vector<8x128xf32>
      tpu.vector_store %arg5[%c0_24, %c0_25], %58 {strides = array<i32>} : memref<8x128xf32, #tpu.memory_space<vmem>>, vector<8x128xf32>,
    } else {
    }
    return
  }
  func.func @transform_0(%arg0: i32, %arg1: i32) -> (i32, i32) {
    %c1_i32 = arith.constant 1 : i32
    %0 = arith.muli %arg0, %c1_i32 : i32
    %1 = arith.addi %0, %arg1 : i32
    %c0_i32 = arith.constant 0 : i32
    %2 = arith.minsi %1, %c0_i32 : i32
    %c0_i32_0 = arith.constant 0 : i32
    %c0_i32_1 = arith.constant 0 : i32
    return %2, %c0_i32_0 : i32, i32
  }
  func.func @transform_1(%arg0: i32, %arg1: i32) -> (i32, i32) {
    %c1_i32 = arith.constant 1 : i32
    %0 = arith.muli %arg0, %c1_i32 : i32
    %1 = arith.addi %0, %arg1 : i32
    %c0_i32 = arith.constant 0 : i32
    %2 = arith.minsi %1, %c0_i32 : i32
    %c0_i32_0 = arith.constant 0 : i32
    %c0_i32_1 = arith.constant 0 : i32
    return %2, %c0_i32_0 : i32, i32
  }
  func.func @transform_2(%arg0: i32, %arg1: i32) -> (i32, i32) {
    %c0_i32 = arith.constant 0 : i32
    %c0_i32_0 = arith.constant 0 : i32
    %c0_i32_1 = arith.constant 0 : i32
    return %c0_i32, %c0_i32_0 : i32, i32
  }
  func.func @transform_3(%arg0: i32, %arg1: i32) -> (i32, i32) {
    %c0_i32 = arith.constant 0 : i32
    %c0_i32_0 = arith.constant 0 : i32
    return %arg0, %c0_i32 : i32, i32
  }
}

</mosaic_0001>

<bundles_post_ra>
// kernel: tpu_custom_call.1
= control target key start
LH: loop header
LB: loop body
LE: loop exit
PB: predicated region body
PF: predicated region fallthrough
CT: control target
= control target key end

     0   :  { %8 = vsyncpa [#allocation4], 0  ;;  %s316_s0 = inlined_call_operand.hbm [shape: f32[8,256], index: 0, kind: input, shape index: {}]   ;;  %s317_s1 = inlined_call_operand.hbm [shape: f32[8,256], index: 1, kind: input, shape index: {}]   ;;  %s318_s2 = inlined_call_operand.vmem [shape: f32[8,1], index: 2, kind: input, shape index: {}]   ;;  %s319_s3 = inlined_call_operand.hbm [shape: f32[8,128], index: 3, kind: output, shape index: {}]  }
   0x1   :  { %9 = vsyncpa [#allocation7], 0 }
   0x2   :  { %10 = vsyncpa [#allocation5], 0  ;;  %s246_s12 = smov [#allocation3]   ;;  %s247_s14 = smov [#allocation6]  }
   0x3   :  { %s23_s13 = sshll.u32 %s246_s12, 4  ;;  %s39_s15 = sshll.u32 %s247_s14, 4  ;;  %s24_s13 = int_to_ptr.vmem [resolvable:$true] %s23_s13  ;;  %s40_s15 = int_to_ptr.vmem [resolvable:$true] %s39_s15 }
   0x4   :  { %s174_s18 = scalar_lea.hbm %s316_s0, 256 }
   0x5   :  { %p175_p0 = scmp.ne.s32.totalorder %s316_s0, %s174_s18  ;;  %p178_p1 = scmp.lt.u32.totalorder %s174_s18, %s316_s0 }
   0x7   :  { %p180_p2 = pnand %p178_p1, %p175_p0 }
   0x9   :  { %183 = shalt.err (!%p180_p2)
}
   0xa   :  { %s184_s23 = scalar_lea.vmem %s24_s13, 256  ;;  %p189_p4 = scmp.lt.s32.totalorder %s24_s13, %s24_s13 }
   0xb   :  { %p185_p3 = scmp.ne.s32.totalorder %s24_s13, %s184_s23  ;;  %p190_p5 = scmp.lt.s32.totalorder %s184_s23, %s184_s23 }
   0xd   :  { %p191_p6 = por %p190_p5, %p189_p4 }
   0xf   :  { %p192_p7 = pnand %p191_p6, %p185_p3 }
  0x11   :  { %195 = shalt.err (!%p192_p7)
}
  0x12   :  { %26 = dma.hbm_to_vmem [thread:$0]  %s316_s0, 256, %s24_s13, [#allocation4]  }
  0x13   :  { %s196_s28 = scalar_lea.hbm %s317_s1, 256 }
  0x14   :  { %p197_p8 = scmp.ne.s32.totalorder %s317_s1, %s196_s28  ;;  %p200_p9 = scmp.lt.u32.totalorder %s196_s28, %s317_s1 }
  0x16   :  { %p202_p10 = pnand %p200_p9, %p197_p8 }
  0x18   :  { %205 = shalt.err (!%p202_p10)
}
  0x19   :  { %s206_s6 = scalar_lea.vmem %s40_s15, 256  ;;  %p211_p12 = scmp.lt.s32.totalorder %s40_s15, %s40_s15 }
  0x1a   :  { %p207_p11 = scmp.ne.s32.totalorder %s40_s15, %s206_s6  ;;  %p212_p13 = scmp.lt.s32.totalorder %s206_s6, %s206_s6 }
  0x1c   :  { %p213_p0 = por %p212_p13, %p211_p12 }
  0x1e   :  { %p214_p1 = pnand %p213_p0, %p207_p11 }
  0x20   :  { %217 = shalt.err (!%p214_p1)
}
  0x21   :  { %42 = dma.hbm_to_vmem [thread:$0]  %s317_s1, 256, %s40_s15, [#allocation7]  }
  0x22   :  { %240 = dma.done.wait [#allocation4], 256  }
  0x23   :  { %241 = vsyncadd [#allocation4], 4294967040 }
  0x24   :  { %242 = dma.done.wait [#allocation7], 256  }
  0x25   :  { %243 = vsyncadd [#allocation7], 4294967040  ;;  %v65_v0 = vld [vmem:[#allocation3] sm:$0xff]  ;;  %v66_v1 = vld [vmem:[#allocation3 + $0x8] sm:$0xff]  ;;  %vm61_vm2 = vcmask 7168   ;;  %v248_v28 = vmov 0.0  }
  0x26   :  { %v71_v2 = vmax.f32 %v65_v0, %v66_v1  ;;  %v67_v3 = vld [vmem:[#allocation6] sm:$0xff]  ;;  %v68_v4 = vld [vmem:[#allocation6 + $0x8] sm:$0xff]  ;;  %62 = vst.msk [vmem:[#allocation2] sm:$0xff] %vm61_vm2, %v248_v28  ;;  %s249_s9 = smov [#allocation8]  }
  0x27   :  { %v85_v5 = vadd.f32 %v68_v4, %v67_v3  ;;  %vm95_vm0 = vcmp.gt.f32.partialorder %v67_v3, 0.0  ;;  %vm96_vm1 = vcmp.gt.f32.partialorder %v68_v4, 0.0  ;;  %v70_v37 = vld [vmem:[%s318_s2] sm:$0xff]  ;;  %s144_s2 = sshll.u32 %s249_s9, 4  ;;  %s145_s2 = int_to_ptr.vmem [resolvable:$true] %s144_s2 }
  0x28   :  { %72 = vmax.xlane.f32.xlu0 %v71_v2  ;;  %v97_v6 = vsel %vm95_vm0, %v67_v3, 1.0  ;;  %v98_v7 = vsel %vm96_vm1, %v68_v4, 1.0  ;;  %s218_s11 = scalar_lea.vmem %s145_s2, 128  ;;  %p223_p3 = scmp.lt.s32.totalorder %s145_s2, %s145_s2 }
  0x29   :  { %86 = vadd.xlane.f32.xlu1 %v85_v5  ;;  %164 = vlog2.f32 %v97_v6  ;;  %p219_p2 = scmp.ne.s32.totalorder %s145_s2, %s218_s11  ;;  %p224_p4 = scmp.lt.s32.totalorder %s218_s11, %s218_s11 }
  0x2a   :  { %166 = vlog2.f32 %v98_v7 }
  0x2b   :  { %p225_p5 = por %p224_p4, %p223_p3 }
  0x2d   :  { %v116_v39 = vld [vmem:[#allocation2] sm:$0xff]  ;;  %p226_p6 = pnand %p225_p5, %p219_p2 }
  0x33   :  { %v165_v15 = vpop.eup %164 }
  0x34   :  { %v167_v16 = vpop.eup %166  ;;  %v100_v18 = vmul.f32 0.6931472, %v165_v15 }
  0x35   :  { %v102_v19 = vmul.f32 0.6931472, %v167_v16 }
  0x36   :  { %v103_v20 = vmul.f32 %v100_v18, %v67_v3 }
  0x37   :  { %v104_v21 = vmul.f32 %v102_v19, %v68_v4 }
  0x38   :  { %v105_v24 = vsel %vm95_vm0, %v103_v20, 0.0 }
  0x39   :  { %v106_v25 = vsel %vm96_vm1, %v104_v21, 0.0 }
  0x3a   :  { %v107_v27 = vadd.f32 %v106_v25, %v105_v24 }
  0xb5   :  { %v73_v8 = vpop.xlane.xlu0 %72 }
  0xb6   :  { %v74_v9 = vsub.f32 %v65_v0, %v73_v8  ;;  %v75_v10 = vsub.f32 %v66_v1, %v73_v8  ;;  %v87_v30 = vpop.xlane.xlu1 %86 }
  0xb8   :  { %v76_v11 = vmul.f32 1.442695, %v74_v9  ;;  %v78_v12 = vmul.f32 1.442695, %v75_v10  ;;  %v88_v13 = vmul.f32 %v74_v9, %v67_v3  ;;  %v89_v14 = vmul.f32 %v75_v10, %v68_v4 }
  0xba   :  { %168 = vpow2.f32 %v76_v11  ;;  %v90_v17 = vadd.f32 %v89_v14, %v88_v13 }
  0xbb   :  { %170 = vpow2.f32 %v78_v12 }
  0xbc   :  { %91 = vadd.xlane.f32.xlu1 %v90_v17 }
  0xc4   :  { %v169_v22 = vpop.eup %168 }
  0xc5   :  { %v171_v23 = vpop.eup %170 }
  0xc6   :  { %v80_v26 = vadd.f32 %v171_v23, %v169_v22 }
  0xc8   :  { %81 = vadd.xlane.f32.xlu0 %v80_v26 }
  0xcc   :  { %108 = vadd.xlane.f32.xlu0 %v107_v27 }
 0x149   :  { %v92_v34 = vpop.xlane.xlu1 %91 }
 0x155   :  { %v82_v29 = vpop.xlane.xlu0 %81 }
 0x156   :  { %172 = vlog2.f32 %v82_v29 }
 0x159   :  { %v109_v35 = vpop.xlane.xlu0 %108 }
 0x160   :  { %v173_v31 = vpop.eup %172 }
 0x161   :  { %v84_v32 = vmul.f32 0.6931472, %v173_v31 }
 0x163   :  { %v93_v33 = vmul.f32 %v87_v30, %v84_v32 }
 0x165   :  { %v94_v36 = vsub.f32 %v93_v33, %v92_v34 }
 0x167   :  { %v110_v38 = vadd.f32 %v109_v35, %v94_v36 }
 0x169   :  { %v117_v40 = vmul.f32 %v110_v38, %v70_v37 }
 0x16b   :  { %v119_v41 = vadd.f32 %v117_v40, %v116_v39 }
 0x16d   :  { %121 = vst.msk [vmem:[#allocation2] sm:$0xff] %vm61_vm2, %v119_v41 }
 0x174   :  { %v125_v42 = vld [vmem:[#allocation2] sm:$0xff] }
 0x175   :  { %v126_v43 = vsel %vm61_vm2, %v125_v42, 0.0 }
 0x176   :  { %127 = vadd.xlane.f32.xlu1 %v126_v43 }
 0x203   :  { %v128_v44 = vpop.xlane.xlu1 %127 }
 0x204   :  { %v129_v45 = vrot.slane %v128_v44, 4 }
 0x206   :  { %v130_v46 = vadd.f32 %v129_v45, %v128_v44 }
 0x208   :  { %v131_v47 = vrot.slane %v130_v46, 2 }
 0x20a   :  { %v132_v48 = vadd.f32 %v131_v47, %v130_v46 }
 0x20c   :  { %v133_v49 = vrot.slane %v132_v48, 1 }
 0x20e   :  { %v134_v50 = vadd.f32 %v133_v49, %v132_v48 }
 0x210   :  { %158 = vpush %v134_v50 }
 0x241   :  { %s159_s10 = spop %158 }
 0x242   :  { %v136_v51 = vstv %s159_s10 }
 0x243   :  { %137 = vst [vmem:[#allocation8] sm:$0xff] %v136_v51 }
 0x244   :  { %229 = shalt.err (!%p226_p6)
}
 0x245   :  { %s230_s14 = scalar_lea.hbm %s319_s3, 128 }
 0x246   :  { %p231_p7 = scmp.ne.s32.totalorder %s319_s3, %s230_s14  ;;  %p234_p8 = scmp.lt.u32.totalorder %s230_s14, %s319_s3 }
 0x248   :  { %p236_p9 = pnand %p234_p8, %p231_p7 }
 0x24a   :  { %239 = shalt.err (!%p236_p9)
}
 0x24b   :  { %147 = dma.vmem_to_hbm [thread:$0]  %s145_s2, 128, %s319_s3, [#allocation5]  }
 0x24c   :  { %244 = dma.done.wait [#allocation5], 128  }
 0x24d   :  { %245 = vsyncadd [#allocation5], 4294967168 }
 0x24e   :  { %151 = vsyncpa [#allocation4], 1 }
 0x24f   :  { %152 = vsyncpa [#allocation7], 1 }
 0x250   :  { %153 = vsyncpa [#allocation5], 1 }

</bundles_post_ra>
